<compile_context>
chip_gen: v6e
topology: v6e:2x2x1
jax: 0.10.0
libtpu: 0.0.40
codegen_flags: <defaults>
</compile_context>

<pallas_src>
import math
from functools import partial

import jax
import jax.numpy as jnp
from jax.experimental import pallas as pl
from jax.experimental.pallas import tpu as pltpu


def _round_up(v, m):
    return ((v + m - 1) // m) * m


def _round_down(v, m):
    return (v // m) * m


def _layer_norm_kernel(x_ref, g_ref, b_ref, o_ref, *, eps: float):
    # x_ref: (br, D); g_ref / b_ref: (1, D). All math in f32, cast on store.
    x = x_ref[...].astype(jnp.float32)
    inv_d = 1.0 / x.shape[-1]

    # Single-pass statistics: one reduction sweep for sum and sum-of-squares.
    s1 = jnp.sum(x, axis=-1, keepdims=True)
    s2 = jnp.sum(x * x, axis=-1, keepdims=True)
    mu = s1 * inv_d
    # E[x^2] - mu^2 can go slightly negative in f32 (cancellation) -> clamp.
    var = jnp.maximum(s2 * inv_d - mu * mu, 0.0)

    inv_std = jax.lax.rsqrt(var + eps)          # EUP rsqrt, no VPU divide
    a = inv_std                                  # (br, 1) per-row scale
    c = -mu * inv_std                            # (br, 1) per-row shift

    g = g_ref[...].astype(jnp.float32)
    b = b_ref[...].astype(jnp.float32)
    o_ref[...] = ((x * a + c) * g + b).astype(o_ref.dtype)


def _reference(x, weight, bias, eps=1e-8):
    # Exact PyTorch formulation (two-pass, unbiased=False).
    mu = x.mean(-1, keepdims=True)
    var = ((x - mu) ** 2).mean(-1, keepdims=True)
    return weight * ((x - mu) / jnp.sqrt(var + eps)) + bias


def _pick_block_rows_and_vmem(rows, D, itemsize):
    """Generation-aware row-tile and VMEM-limit selection."""
    try:
        info = pltpu.get_tpu_info()
        vmem_cap = int(getattr(info, "vmem_capacity_bytes", 64 << 20))
    except Exception:  # conservative (v7x-sized) fallback if query unavailable
        vmem_cap = 64 << 20

    budget = int(0.70 * vmem_cap)                # headroom for compiler scratch

    # Per-row pipeline footprint: 2x input + 2x output buffers (I/O dtype)
    # plus ~2x f32 working copies (x cast, x*x) that may materialize in VMEM.
    per_row_pipeline = 4 * D * itemsize + 2 * D * 4

    # Per-step I/O target: ~8 MiB on v7x-sized VMEM, ~16 MiB on v5e/v6e;
    # beyond ~2 MiB-class tiles the step-overhead amortization curve flattens.
    target_io = (8 << 20) if vmem_cap <= (64 << 20) else (16 << 20)
    br_target = max(8, _round_down(target_io // (2 * D * itemsize), 8))
    br_vmem = max(8, _round_down(max(budget - (4 << 20), 0) // per_row_pipeline, 8))
    br = min(br_target, br_vmem)

    # Keep >= ~4 grid steps when rows allow it so v7x's two TensorCores get
    # balanced work under dimension_semantics=("parallel",).
    if rows >= 4 * 8:
        br = min(br, max(8, _round_down(rows // 4, 8)))

    # Never make the block taller than the (8-rounded) total row count.
    br = max(8, min(br, _round_up(rows, 8)))

    footprint = br * per_row_pipeline + 4 * D * 4 + (2 << 20)
    vmem_limit = int(min(max(footprint, 4 << 20), max(budget, 4 << 20)))
    return br, vmem_limit


def layer_norm(x, weight, bias, *, eps: float = 1e-8, force_pallas: bool = False):
    """LayerNorm over the last dim of x. weight/bias: (D,)."""
    orig_shape = x.shape
    D = orig_shape[-1]
    rows = math.prod(orig_shape[:-1]) if len(orig_shape) > 1 else 1

    # Narrow / non lane-dense feature dims hit masked partial stores and mostly
    # empty vregs in this layout; plain XLA is the better tool there.
    if D % 128 != 0 and not force_pallas:
        return _reference(x, weight, bias, eps)

    x2 = x.reshape(rows, D)
    g2 = weight.reshape(1, D)
    b2 = bias.reshape(1, D)

    br, vmem_limit = _pick_block_rows_and_vmem(rows, D, x.dtype.itemsize)

    # Ragged last block: no external pad/slice. Pallas masks the partial block;
    # padded reads only feed discarded rows since LN stats are per-row.
    grid = (pl.cdiv(rows, br),)

    out = pl.pallas_call(
        partial(_layer_norm_kernel, eps=eps),
        out_shape=jax.ShapeDtypeStruct((rows, D), x.dtype),
        grid_spec=pltpu.PrefetchScalarGridSpec(
            num_scalar_prefetch=0,
            grid=grid,
            in_specs=[
                pl.BlockSpec((br, D), lambda i: (i, 0)),   # x rows
                pl.BlockSpec((1, D), lambda i: (0, 0)),    # weight (resident)
                pl.BlockSpec((1, D), lambda i: (0, 0)),    # bias (resident)
            ],
            out_specs=pl.BlockSpec((br, D), lambda i: (i, 0)),
        ),
        compiler_params=pltpu.CompilerParams(
            dimension_semantics=("parallel",),   # rows independent -> v7x megacore
            vmem_limit_bytes=vmem_limit,
        ),
    )(x2, g2, b2)

    return out.reshape(orig_shape)


if __name__ == "__main__":
    key = jax.random.PRNGKey(0)
    k1, k2, k3 = jax.random.split(key, 3)

    # Primary (Pallas path): lane-dense D=128, multi-step grid with a ragged
    # last block (rows = 36, br = 8 -> grid of 5 with a 4-row tail).
    B, S, D = 4, 9, 128
    x = jax.random.normal(k1, (B, S, D), jnp.float32)
    weight = 1.0 + 0.1 * jax.random.normal(k2, (D,), jnp.float32)
    bias = 0.1 * jax.random.normal(k3, (D,), jnp.float32)

    y = jax.block_until_ready(layer_norm(x, weight, bias, eps=1e-8))
    y_ref = _reference(x, weight, bias, eps=1e-8)
    assert y.shape == x.shape
    assert jnp.allclose(y, y_ref, rtol=1e-4, atol=1e-4), float(jnp.max(jnp.abs(y - y_ref)))

    # Ragged row count that is not a multiple of 8 (rows = 15) — single padded block.
    x2 = jax.random.normal(k1, (3, 5, D), jnp.float32)
    y2 = jax.block_until_ready(layer_norm(x2, weight, bias, eps=1e-8))
    y2_ref = _reference(x2, weight, bias, eps=1e-8)
    assert jnp.allclose(y2, y2_ref, rtol=1e-4, atol=1e-4)

    # Narrow-D path: kernel still handles it when forced (correct, just not the
    # lane-dense fast path); default wrapper would route this to XLA.
    Dn = 32
    xn = jax.random.normal(k1, (2, 8, Dn), jnp.float32)
    wn = 1.0 + 0.1 * jax.random.normal(k2, (Dn,), jnp.float32)
    bn = 0.1 * jax.random.normal(k3, (Dn,), jnp.float32)
    yn = jax.block_until_ready(layer_norm(xn, wn, bn, eps=1e-8, force_pallas=True))
    assert jnp.allclose(yn, _reference(xn, wn, bn, eps=1e-8), rtol=1e-4, atol=1e-4)

    print("KERNEL_OK")
</pallas_src>

<mosaic_0001>
module attributes {stable_mosaic.version = 11 : i64} {
  func.func @_layer_norm_kernel(%arg0: i32, %arg1: memref<8x128xf32, #tpu.memory_space<vmem>>, %arg2: memref<1x128xf32, #tpu.memory_space<vmem>>, %arg3: memref<1x128xf32, #tpu.memory_space<vmem>>, %arg4: memref<8x128xf32, #tpu.memory_space<vmem>>) attributes {dimension_semantics = [#tpu.dimension_semantics<parallel>], iteration_bounds = array<i64: 5>, scalar_prefetch = 0 : i64, scratch_operands = 0 : i64, tpu.core_type = #tpu.core_type<tc>, window_params = [{transform_indices = @transform_0, window_bounds = array<i64: 8, 128>}, {pipeline_mode = #tpu.pipeline_mode<synchronous>, transform_indices = @transform_1, window_bounds = array<i64: 1, 128>}, {pipeline_mode = #tpu.pipeline_mode<synchronous>, transform_indices = @transform_2, window_bounds = array<i64: 1, 128>}, {transform_indices = @transform_3, window_bounds = array<i64: 8, 128>}]} {
    %c0 = arith.constant 0 : index
    %c0_0 = arith.constant 0 : index
    %0 = vector.load %arg1[%c0, %c0_0] : memref<8x128xf32, #tpu.memory_space<vmem>>, vector<8x128xf32>
    %cst = arith.constant dense<0.000000e+00> : vector<8xf32>
    %1 = vector.multi_reduction <add>, %0, %cst [1] : vector<8x128xf32> to vector<8xf32>
    %2 = vector.shape_cast %1 : vector<8xf32> to vector<8x1xf32>
    %3 = arith.mulf %0, %0 : vector<8x128xf32>
    %cst_1 = arith.constant dense<0.000000e+00> : vector<8xf32>
    %4 = vector.multi_reduction <add>, %3, %cst_1 [1] : vector<8x128xf32> to vector<8xf32>
    %5 = vector.shape_cast %4 : vector<8xf32> to vector<8x1xf32>
    %cst_2 = arith.constant 7.812500e-03 : f32
    %6 = vector.broadcast %cst_2 : f32 to vector<8x1xf32>
    %7 = arith.mulf %2, %6 : vector<8x1xf32>
    %cst_3 = arith.constant 7.812500e-03 : f32
    %8 = vector.broadcast %cst_3 : f32 to vector<8x1xf32>
    %9 = arith.mulf %5, %8 : vector<8x1xf32>
    %10 = arith.mulf %7, %7 : vector<8x1xf32>
    %11 = arith.subf %9, %10 : vector<8x1xf32>
    %cst_4 = arith.constant 0.000000e+00 : f32
    %12 = vector.broadcast %cst_4 : f32 to vector<8x1xf32>
    %13 = arith.maximumf %11, %12 : vector<8x1xf32>
    %cst_5 = arith.constant 9.99999993E-9 : f32
    %14 = vector.broadcast %cst_5 : f32 to vector<8x1xf32>
    %15 = arith.addf %13, %14 : vector<8x1xf32>
    %16 = math.rsqrt %15 : vector<8x1xf32>
    %cst_6 = arith.constant 0.000000e+00 : f32
    %17 = vector.broadcast %cst_6 : f32 to vector<8x1xf32>
    %18 = arith.subf %17, %7 : vector<8x1xf32>
    %19 = arith.mulf %18, %16 : vector<8x1xf32>
    %c0_7 = arith.constant 0 : index
    %c0_8 = arith.constant 0 : index
    %20 = vector.load %arg2[%c0_7, %c0_8] : memref<1x128xf32, #tpu.memory_space<vmem>>, vector<1x128xf32>
    %c0_9 = arith.constant 0 : index
    %c0_10 = arith.constant 0 : index
    %21 = vector.load %arg3[%c0_9, %c0_10] : memref<1x128xf32, #tpu.memory_space<vmem>>, vector<1x128xf32>
    %22 = vector.broadcast %16 : vector<8x1xf32> to vector<8x128xf32>
    %23 = arith.mulf %0, %22 : vector<8x128xf32>
    %24 = vector.broadcast %19 : vector<8x1xf32> to vector<8x128xf32>
    %25 = arith.addf %23, %24 : vector<8x128xf32>
    %26 = vector.broadcast %20 : vector<1x128xf32> to vector<8x128xf32>
    %27 = arith.mulf %25, %26 : vector<8x128xf32>
    %28 = vector.broadcast %21 : vector<1x128xf32> to vector<8x128xf32>
    %29 = arith.addf %27, %28 : vector<8x128xf32>
    %c0_11 = arith.constant 0 : index
    %c0_12 = arith.constant 0 : index
    %30 = vector.load %arg4[%c0_11, %c0_12] : memref<8x128xf32, #tpu.memory_space<vmem>>, vector<8x128xf32>
    tpu.vector_store %arg4[%c0_11, %c0_12], %29 {strides = array<i32>} : memref<8x128xf32, #tpu.memory_space<vmem>>, vector<8x128xf32>,
    return
  }
  func.func @transform_0(%arg0: i32) -> (i32, i32) {
    %c0_i32 = arith.constant 0 : i32
    %c0_i32_0 = arith.constant 0 : i32
    return %arg0, %c0_i32 : i32, i32
  }
  func.func @transform_1(%arg0: i32) -> (i32, i32) {
    %c0_i32 = arith.constant 0 : i32
    %c0_i32_0 = arith.constant 0 : i32
    %c0_i32_1 = arith.constant 0 : i32
    return %c0_i32, %c0_i32_0 : i32, i32
  }
  func.func @transform_2(%arg0: i32) -> (i32, i32) {
    %c0_i32 = arith.constant 0 : i32
    %c0_i32_0 = arith.constant 0 : i32
    %c0_i32_1 = arith.constant 0 : i32
    return %c0_i32, %c0_i32_0 : i32, i32
  }
  func.func @transform_3(%arg0: i32) -> (i32, i32) {
    %c0_i32 = arith.constant 0 : i32
    %c0_i32_0 = arith.constant 0 : i32
    return %arg0, %c0_i32 : i32, i32
  }
}

</mosaic_0001>

<bundles_post_ra>
// kernel: tpu_custom_call.1
= control target key start
LH: loop header
LB: loop body
LE: loop exit
PB: predicated region body
PF: predicated region fallthrough
CT: control target
= control target key end

     0   :  { %8 = vsyncpa [#allocation3], 0  ;;  %s627_s0 = inlined_call_operand.hbm [shape: f32[36,128], index: 0, kind: input, shape index: {}]   ;;  %s628_s1 = inlined_call_operand.vmem [shape: f32[1,128], index: 1, kind: input, shape index: {}]   ;;  %s629_s2 = inlined_call_operand.vmem [shape: f32[1,128], index: 2, kind: input, shape index: {}]   ;;  %s630_s3 = inlined_call_operand.hbm [shape: f32[36,128], index: 3, kind: output, shape index: {}]  }
   0x1   :  { %10 = vsyncpa [#allocation3 + $0x1], 0 }
   0x2   :  { %11 = vsyncpa [#allocation4], 0 }
   0x3   :  { %13 = vsyncpa [#allocation4 + $0x1], 0  ;;  %s482_s12 = smov 0   ;;  %s484_s13 = smov 0  }
   0x4   :  { %s486_s14 = smov 0   ;;  %s488_s15 = smov 0  }
   0x5 LB: > { %s503_s16 = sadd.s32 4294967295, %s458_s15   ;;  %s304_s17 = sadd.s32 4294967294, %s458_s15   ;;  %s458_s15 = sphi %s488_s15, %s646_s15   ;;  %s454_s14 = sphi %s486_s14, %s645_s14   ;;  %s450_s13 = sphi %s484_s13, %s644_s13   ;;  %s446_s12 = sphi %s482_s12, %s643_s12  }
   0x6   : > { %s507_s18 = sadd.s32 1, %s458_s15   ;;  %s26_s19 = sadd.s32 1, %s454_s14 }
   0x7   : > { %s23_s20 = ssub.s32 %s458_s15, %s507_s18  ;;  %p33_p0 = scmp.ne.s32.totalorder %s454_s14, %s450_s13 }
   0x8   : > { %p24_p1 = scmp.eq.s32.totalorder %s23_s20, 0  ;;  %p34_p2 = scmp.eq.s32.totalorder %s458_s15, 0 }
   0x9   : > { %p39_p3 = scmp.ne.s32.totalorder %s450_s13, %s446_s12  ;;  %p40_p4 = scmp.eq.s32.totalorder %s503_s16, 0 }
   0xa   : > { %s519_s21 = scalar_select %p24_p1, %s454_s14, %s26_s19  }
   0xb   : > { %p521_p5 = por %p34_p2, %p33_p0  ;;  %p525_p6 = por %p40_p4, %p39_p3 }
   0xc   : > { %p105_p7 = scmp.eq.s32.totalorder %s503_s16, 4  ;;  %p111_p8 = scmp.eq.s32.totalorder %s304_s17, 4 }
   0xd   : > { %s634_s23 = scalar_select %p525_p6, 1, 0 }
   0xe   : > { %p330_p9 = scmp.lt.s32.totalorder %s458_s15, 5  ;;  %p531_p10 = por %p105_p7, %p33_p0 }
   0xf   : > { %p535_p11 = por %p111_p8, %p39_p3  ;;  %s137_s26 = sand.u32 1, %s454_s14  }
  0x10   : > { %s635_s24 = scalar_select %p531_p10, 1, 0 }
  0x11   : > { %s636_s25 = scalar_select %p535_p11, 1, 0 }
  0x12   : > { %s308_s27 = sshll.u32 %s458_s15, 7  ;;  %s307_s28 = sshll.u32 %s137_s26, 3 }
  0x13   : > { %s544_s4 = scalar_lea.hbm %s627_s0, %s308_s27  ;;  %s141_s5 = scalar_lea.vmem [#allocation2], %s307_s28 }
  0x14   : > { %s148_s6 = sshll.u32 %s141_s5, 4  ;;  %p548_p12 = pnand %p330_p9, %p521_p5  ;;  %s552_s6 = int_to_ptr.vmem [resolvable:$true] %s148_s6 }
  0x15   : > { %s138_s8 = scalar_lea.sflag [#allocation3], %s137_s26  ;;  %s366_s9 = scalar_lea.hbm %s544_s4, 128 }
  0x16   : > { %p367_p1 = scmp.ne.s32.totalorder %s544_s4, %s366_s9  ;;  %p368_p2 = pneg %p548_p12 }
  0x17   : > { %s371_s17 = scalar_lea.hbm %s627_s0, 640  ;;  %p372_p5 = scmp.lt.s32.totalorder %s544_s4, %s627_s0 }
  0x18   : > { %p369_p3 = pnand %p368_p2, %p367_p1  ;;  %p373_p7 = scmp.lt.s32.totalorder %s371_s17, %s366_s9 }
  0x1a   : > { %p370_p4 = pneg %p369_p3  ;;  %p374_p8 = por %p373_p7, %p372_p5 }
  0x1c   : > { %p375_p9 = pnand %p374_p8, %p370_p4 }
  0x1e   : > { %378 = shalt.err (!%p375_p9)
}
  0x1f   : > { %s379_s22 = scalar_lea.vmem %s552_s6, 128  ;;  %s460_s26 = smov [#allocation2]  }
  0x20   : > { %p380_p13 = scmp.ne.s32.totalorder %s552_s6, %s379_s22  ;;  %s384_s27 = sshll.u32 %s460_s26, 4  ;;  %s385_s27 = int_to_ptr.vmem [resolvable:$false] %s384_s27 }
  0x21   : > { %s386_s28 = scalar_lea.vmem %s385_s27, 256  ;;  %p387_p3 = scmp.lt.s32.totalorder %s552_s6, %s385_s27 }
  0x22   : > { %p382_p0 = pnand %p380_p13, %p368_p2  ;;  %p388_p11 = scmp.lt.s32.totalorder %s386_s28, %s379_s22 }
  0x24   : > { %p383_p1 = pneg %p382_p0  ;;  %p389_p10 = por %p388_p11, %p387_p3 }
  0x26   : > { %p390_p6 = pnand %p389_p10, %p383_p1 }
  0x28   : > { %393 = shalt.err (!%p390_p6)
}
  0x29   : > { %325 = dma.hbm_to_vmem [thread:$0]  (!%p548_p12), %s544_s4, 128, %s552_s6, %s138_s8  }
  0x2a   : > { %p638_p4 = scmp.lt.s32.totalorder %s458_s15, 6  ;;  %p639_p5 = scmp.ge.s32.totalorder %s458_s15, 1 }
  0x2c   : > { %p154_p13 = pnand %p639_p5, %p638_p4 }
  0x2d   : > { %s579_s29 = sand.u32 (!%p154_p13), 1, %s450_s13   ;;  %p640_p6 = scmp.ne.s32.totalorder (!%p154_p13), %s634_s23, 0 }
  0x2e   : > { %157 = sbr.rel (%p154_p13) target bundleno = 238 (0xee), region = 32  ;;  %s310_s30 = sshll.u32 (!%p154_p13), %s579_s29, 3 }
  0x2f   : > { %s160_s5 = scalar_lea.sflag (!%p154_p13), [#allocation3], %s579_s29  ;;  %s163_s9 = scalar_lea.vmem (!%p154_p13), [#allocation2], %s310_s30 }
  0x33   : > { %437 = dma.done.wait (%p640_p6), %s160_s5, 128  }
  0x34   : > { %439 = vsyncadd (%p640_p6), %s160_s5, 4294967168  ;;  %v186_v0 = vld [vmem:[%s163_s9] sm:$0xff]  ;;  %s315_s8 = sshll.u32 %s503_s16, 7  ;;  %s185_s10 = scalar_lea.vmem [#allocation5], %s310_s30 }
  0x35   : > { %187 = vadd.xlane.f32.xlu0 %v186_v0  ;;  %v189_v1 = vmul.f32 %v186_v0, %v186_v0  ;;  %v312_v14 = vld [vmem:[%s628_s1] ss:$0 sm:$0xff]  ;;  %s234_s11 = sshll.u32 %s185_s10, 4  ;;  %s232_s20 = scalar_lea.hbm %s630_s3, %s315_s8  ;;  %s235_s11 = int_to_ptr.vmem [resolvable:$true] %s234_s11 }
  0x36   : > { %v313_v16 = vld [vmem:[%s629_s2] ss:$0 sm:$0xff]  ;;  %s221_s22 = scalar_lea.sflag [#allocation4], %s579_s29  ;;  %s394_s26 = scalar_lea.vmem %s235_s11, 128 }
  0x37   : > { %p395_p10 = scmp.ne.s32.totalorder %s235_s11, %s394_s26  ;;  %p641_p11 = scmp.ne.s32.totalorder %s635_s24, 0 }
  0x38   : > { %s461_s27 = smov [#allocation5]  }
  0x39   : > { %190 = vadd.xlane.f32.xlu0 %v189_v1  ;;  %p396_p12 = pnand %p395_p10, %p641_p11  ;;  %s398_s28 = sshll.u32 %s461_s27, 4  ;;  %s399_s28 = int_to_ptr.vmem [resolvable:$false] %s398_s28 }
  0x3a   : > { %s400_s16 = scalar_lea.vmem %s399_s28, 256  ;;  %p401_p2 = scmp.lt.s32.totalorder %s235_s11, %s399_s28 }
  0x3b   : > { %p397_p0 = pneg %p396_p12  ;;  %p402_p7 = scmp.lt.s32.totalorder %s400_s16, %s394_s26 }
  0x3d   : > { %p403_p8 = por %p402_p7, %p401_p2 }
  0x3f   : > { %p404_p9 = pnand %p403_p8, %p397_p0 }
  0xbe   : > { %v188_v2 = vpop.xlane.xlu0 %187 }
  0xbf   : > { %v192_v3 = vmul.f32 0.0078125, %v188_v2 }
  0xc1   : > { %v194_v5 = vmul.f32 %v192_v3, %v192_v3  ;;  %v199_v10 = vsub.f32 0.0, %v192_v3 }
  0xc2   : > { %v191_v4 = vpop.xlane.xlu0 %190 }
  0xc3   : > { %v193_v6 = vmul.f32 0.0078125, %v191_v4 }
  0xc5   : > { %v195_v7 = vsub.f32 %v193_v6, %v194_v5 }
  0xc7   : > { %v196_v8 = vmax.f32 %v195_v7, 0.0 }
  0xc9   : > { %v197_v9 = vadd.f32 1e-08, %v196_v8 }
  0xcb   : > { %364 = vrsqrt.f32 %v197_v9 }
  0xd8   : > { %v365_v11 = vpop.eup %364 }
  0xd9   : > { %v200_v12 = vmul.f32 %v365_v11, %v199_v10  ;;  %v203_v13 = vmul.f32 %v365_v11, %v186_v0 }
  0xdb   : > { %v204_v15 = vadd.f32 %v203_v13, %v200_v12 }
  0xdd   : > { %v211_v17 = vmul.f32 %v312_v14, %v204_v15 }
  0xdf   : > { %v218_v18 = vadd.f32 %v313_v16, %v211_v17 }
  0xe1   : > { %219 = vst [vmem:[%s185_s10] sm:$0xff] %v218_v18 }
  0xe2   : > { %407 = shalt.err (!%p404_p9)
}
  0xe3   : > { %s408_s30 = scalar_lea.hbm %s232_s20, 128  ;;  %s412_s9 = scalar_lea.hbm %s630_s3, 640 }
  0xe4   : > { %p409_p1 = scmp.ne.s32.totalorder %s232_s20, %s408_s30  ;;  %p413_p5 = scmp.lt.s32.totalorder %s232_s20, %s630_s3 }
  0xe5   : > { %p414_p13 = scmp.lt.s32.totalorder %s412_s9, %s408_s30 }
  0xe6   : > { %p410_p3 = pnand %p409_p1, %p641_p11 }
  0xe7   : > { %p415_p6 = por %p414_p13, %p413_p5 }
  0xe8   : > { %p411_p4 = pneg %p410_p3 }
  0xea   : > { %p416_p10 = pnand %p415_p6, %p411_p4 }
  0xec   : > { %419 = shalt.err (!%p416_p10)
}
  0xed   : > { %320 = dma.vmem_to_hbm [thread:$0]  (%p641_p11), %s235_s11, 128, %s232_s20, %s221_s22  }
  0xee PF: > { %p331_p12 = scmp.ge.s32.totalorder %s458_s15, 2  ;;  %s246_s6 = sand.u32 1, %s446_s12  }
  0xef   : > { %p642_p0 = scmp.ne.s32.totalorder %s636_s25, 0  ;;  %s247_s7 = scalar_lea.sflag [#allocation4], %s246_s6 }
  0xf1   : > { %p327_p2 = pnand %p331_p12, %p642_p0 }
  0xf3   : > { %p328_p7 = pneg %p327_p2 }
  0xf5   : > { %441 = dma.done.wait (%p328_p7), %s247_s7, 128  }
  0xf6   : > { %443 = vsyncadd (%p328_p7), %s247_s7, 4294967168  ;;  %p16_p8 = scmp.ge.s32.totalorder %s507_s18, 7   ;;  %s643_s12 = smov %s450_s13 }
  0xf7   : > { %s644_s13 = smov %s454_s14  ;;  %s645_s14 = smov %s519_s21 }
  0xf8   : > { %s646_s15 = smov %s507_s18  ;;  %18 = sbr.rel (!%p16_p8) target bundleno = 5 (0x5), region = 77 }
  0xfd   :  { %252 = vsyncpa [#allocation3], 1 }
  0xfe   :  { %254 = vsyncpa [#allocation3 + $0x1], 1 }
  0xff   :  { %255 = vsyncpa [#allocation4], 1 }
 0x100   :  { %257 = vsyncpa [#allocation4 + $0x1], 1 }

</bundles_post_ra>
